<compile_context>
chip_gen: v5e
topology: v5e:2x2
jax: 0.10.0
libtpu: 0.0.40
codegen_flags: <defaults>
</compile_context>

<pallas_src>
import jax
import jax.numpy as jnp
from jax.experimental import pallas as pl
from jax.experimental.pallas import tpu as pltpu


# --------------------------------------------------------------------------
# Kernel: one tile of  y = x @ W + b
# --------------------------------------------------------------------------
def _fused_linear_kernel(x_ref, w_ref, b_ref, o_ref):
    # MXU matmul with f32 accumulation + VPU bias add, all resident in VMEM.
    acc = jnp.dot(x_ref[...], w_ref[...], preferred_element_type=jnp.float32)
    o_ref[...] = (acc + b_ref[...]).astype(o_ref.dtype)


def _round_up(n, m):
    return ((n + m - 1) // m) * m


def _pick_tile(total, candidates):
    """Largest candidate that evenly divides `total` (total is pre-padded)."""
    for c in candidates:
        if total % c == 0:
            return c
    return total


def fused_linear(x, w, b):
    """Compute x @ w + b with a tiled, pipelined Pallas kernel.

    x: (B, K)   w: (K, N)  (pre-transposed vs. torch)   b: (N,)  ->  (B, N)
    B is padded to a multiple of 8 (sublanes), N to a multiple of 128 (lanes);
    padding is sliced off before returning.
    """
    B, K = x.shape
    K2, N = w.shape
    assert K == K2 and b.shape == (N,)

    # --- pad to hardware-friendly shapes (zeros; sliced off below) ----------
    Bp = _round_up(B, 8)
    Np = _round_up(N, 128)
    xp = jnp.pad(x, ((0, Bp - B), (0, 0)))
    wp = jnp.pad(w, ((0, 0), (0, Np - N)))
    bp = jnp.pad(b, ((0, Np - N),)).reshape(1, Np)  # (1, Np) for lane broadcast

    # --- tile plan -----------------------------------------------------------
    # Sized so (2 double-buffers per input + output tile) stays well under
    # v7x's 64 MiB VMEM even at large K / img_size.
    tb = _pick_tile(Bp, (256, 128, 64, 32, 16, 8))
    tn = _pick_tile(Np, (512, 384, 256, 128))
    grid = (Bp // tb, Np // tn)

    cost = pl.CostEstimate(
        flops=2 * Bp * K * Np,
        transcendentals=0,
        bytes_accessed=(xp.size + wp.size + bp.size + Bp * Np) * xp.dtype.itemsize,
    )

    out_p = pl.pallas_call(
        _fused_linear_kernel,
        out_shape=jax.ShapeDtypeStruct((Bp, Np), x.dtype),
        grid_spec=pltpu.PrefetchScalarGridSpec(
            num_scalar_prefetch=0,
            grid=grid,
            in_specs=[
                pl.BlockSpec((tb, K), lambda i, j: (i, 0)),   # x tile (K untiled)
                pl.BlockSpec((K, tn), lambda i, j: (0, j)),   # weight N-tile
                pl.BlockSpec((1, tn), lambda i, j: (0, j)),   # bias N-tile
            ],
            out_specs=pl.BlockSpec((tb, tn), lambda i, j: (i, j)),
        ),
        compiler_params=pltpu.CompilerParams(
            dimension_semantics=("parallel", "parallel"),
        ),
        cost_estimate=cost,
    )(xp, wp, bp)

    return out_p[:B, :N]


# --------------------------------------------------------------------------
# Params: mirror nn.Linear init, stored pre-transposed as (in, out)
# --------------------------------------------------------------------------
def init_mtask_params(key, in_features, n_classes, img_size, dtype=jnp.float32):
    """Deterministic init mirroring nn.Linear's U(-1/sqrt(fan_in), +1/sqrt(fan_in))."""
    k1, k2, k3, k4 = jax.random.split(key, 4)
    bound = 1.0 / jnp.sqrt(jnp.asarray(in_features, dtype))
    img_out = 3 * img_size * img_size
    return {
        # stored as (in_features, out_features) == W^T of the torch layer
        "w_img": jax.random.uniform(k1, (in_features, img_out), dtype, -bound, bound),
        "b_img": jax.random.uniform(k2, (img_out,), dtype, -bound, bound),
        "w_lbl": jax.random.uniform(k3, (in_features, n_classes), dtype, -bound, bound),
        "b_lbl": jax.random.uniform(k4, (n_classes,), dtype, -bound, bound),
    }


def fuse_mtask_params(params):
    """Concatenate both heads along the output axis (done once, amortized)."""
    w_fused = jnp.concatenate([params["w_img"], params["w_lbl"]], axis=1)
    b_fused = jnp.concatenate([params["b_img"], params["b_lbl"]], axis=0)
    n_img = params["w_img"].shape[1]
    n_lbl = params["w_lbl"].shape[1]
    return w_fused, b_fused, n_img, n_lbl


# --------------------------------------------------------------------------
# Forward: equivalent of MtaskLayer.forward
# --------------------------------------------------------------------------
def mtask_forward(params, x, img_size):
    w_fused, b_fused, n_img, n_lbl = fuse_mtask_params(params)
    y = fused_linear(x, w_fused, b_fused)              # (B, n_img + n_lbl)
    images = y[:, :n_img].reshape(-1, 3, img_size, img_size)  # NCHW
    labels = y[:, n_img:n_img + n_lbl]                 # (B, n_classes)
    return {"images": images, "labels": labels}


if __name__ == "__main__":
    # Small shapes consistent with the module: batch=2, in_features=32,
    # img_size=8 (-> 3*8*8 = 192 image logits), n_classes=10.
    B, IN_FEATURES, N_CLASSES, IMG_SIZE = 2, 32, 10, 8

    key = jax.random.PRNGKey(0)
    kx, kp = jax.random.split(key)
    x = jax.random.normal(kx, (B, IN_FEATURES), dtype=jnp.float32)
    params = init_mtask_params(kp, IN_FEATURES, N_CLASSES, IMG_SIZE)

    out = jax.jit(mtask_forward, static_argnums=2)(params, x, IMG_SIZE)
    jax.block_until_ready(out)

    # Sanity check against plain-JAX reference.
    ref_img = (x @ params["w_img"] + params["b_img"]).reshape(-1, 3, IMG_SIZE, IMG_SIZE)
    ref_lbl = x @ params["w_lbl"] + params["b_lbl"]
    assert out["images"].shape == (B, 3, IMG_SIZE, IMG_SIZE)
    assert out["labels"].shape == (B, N_CLASSES)
    assert jnp.allclose(out["images"], ref_img, atol=1e-5)
    assert jnp.allclose(out["labels"], ref_lbl, atol=1e-5)

    print("KERNEL_OK")
</pallas_src>

<mosaic_0001>
module attributes {stable_mosaic.version = 11 : i64} {
  func.func @_fused_linear_kernel(%arg0: i32, %arg1: i32, %arg2: memref<8x32xf32, #tpu.memory_space<vmem>>, %arg3: memref<32x256xf32, #tpu.memory_space<vmem>>, %arg4: memref<1x256xf32, #tpu.memory_space<vmem>>, %arg5: memref<8x256xf32, #tpu.memory_space<vmem>>) attributes {dimension_semantics = [#tpu.dimension_semantics<parallel>, #tpu.dimension_semantics<parallel>], iteration_bounds = array<i64: 1, 1>, scalar_prefetch = 0 : i64, scratch_operands = 0 : i64, tpu.core_type = #tpu.core_type<tc>, window_params = [{transform_indices = @transform_0, window_bounds = array<i64: 8, 32>}, {transform_indices = @transform_1, window_bounds = array<i64: 32, 256>}, {transform_indices = @transform_2, window_bounds = array<i64: 1, 256>}, {transform_indices = @transform_3, window_bounds = array<i64: 8, 256>}]} {
    %c0 = arith.constant 0 : index
    %c0_0 = arith.constant 0 : index
    %0 = vector.load %arg2[%c0, %c0_0] : memref<8x32xf32, #tpu.memory_space<vmem>>, vector<8x32xf32>
    %c0_1 = arith.constant 0 : index
    %c0_2 = arith.constant 0 : index
    %1 = vector.load %arg3[%c0_1, %c0_2] : memref<32x256xf32, #tpu.memory_space<vmem>>, vector<32x256xf32>
    %cst = arith.constant dense<0.000000e+00> : vector<8x256xf32>
    %2 = tpu.matmul %0, %1, %cst {dimension_numbers = #tpu.dot_dimension_numbers<[1], [0], [0], [1], [0, 0, 1, 1], [], []>} : vector<8x32xf32>, vector<32x256xf32>, vector<8x256xf32> -> vector<8x256xf32>
    %c0_3 = arith.constant 0 : index
    %c0_4 = arith.constant 0 : index
    %3 = vector.load %arg4[%c0_3, %c0_4] : memref<1x256xf32, #tpu.memory_space<vmem>>, vector<1x256xf32>
    %4 = vector.broadcast %3 : vector<1x256xf32> to vector<8x256xf32>
    %5 = arith.addf %2, %4 : vector<8x256xf32>
    %c0_5 = arith.constant 0 : index
    %c0_6 = arith.constant 0 : index
    %6 = vector.load %arg5[%c0_5, %c0_6] : memref<8x256xf32, #tpu.memory_space<vmem>>, vector<8x256xf32>
    tpu.vector_store %arg5[%c0_5, %c0_6], %5 {strides = array<i32>} : memref<8x256xf32, #tpu.memory_space<vmem>>, vector<8x256xf32>,
    return
  }
  func.func @transform_0(%arg0: i32, %arg1: i32) -> (i32, i32) {
    %c0_i32 = arith.constant 0 : i32
    %c0_i32_0 = arith.constant 0 : i32
    return %arg0, %c0_i32 : i32, i32
  }
  func.func @transform_1(%arg0: i32, %arg1: i32) -> (i32, i32) {
    %c0_i32 = arith.constant 0 : i32
    %c0_i32_0 = arith.constant 0 : i32
    return %c0_i32, %arg1 : i32, i32
  }
  func.func @transform_2(%arg0: i32, %arg1: i32) -> (i32, i32) {
    %c0_i32 = arith.constant 0 : i32
    %c0_i32_0 = arith.constant 0 : i32
    return %c0_i32, %arg1 : i32, i32
  }
  func.func @transform_3(%arg0: i32, %arg1: i32) -> (i32, i32) {
    %c0_i32 = arith.constant 0 : i32
    return %arg0, %arg1 : i32, i32
  }
}

</mosaic_0001>

<bundles_post_ra>
// kernel: mtask_forward.1
= control target key start
LH: loop header
LB: loop body
LE: loop exit
PB: predicated region body
PF: predicated region fallthrough
CT: control target
= control target key end

     0   :  { %vm29_vm0 = vcmask 261120   ;;  %s137_s1 = inlined_call_operand.vmem [shape: f32[32,256], index: 1, kind: input, shape index: {}]   ;;  %s138_s0 = inlined_call_operand.vmem [shape: f32[8,32], index: 0, kind: input, shape index: {}]   ;;  %s139_s2 = inlined_call_operand.vmem [shape: f32[1,256], index: 2, kind: input, shape index: {}]   ;;  %s140_s3 = inlined_call_operand.vmem [shape: f32[8,256], index: 3, kind: output, shape index: {}]  }
   0x1   :  { %v21_v0 = vld [vmem:[%s137_s1 + $0x30] sm:$0xff]  ;;  %v22_v1 = vld [vmem:[%s137_s1 + $0x38] sm:$0xff]  ;;  %v19_v2 = vld [vmem:[%s137_s1 + $0x20] sm:$0xff] }
   0x2   :  { %45 = vmatpush.msra.mxu0 %v21_v0  ;;  %65 = vmatpush.msra.mxu1 %v22_v1  ;;  %v20_v3 = vld [vmem:[%s137_s1 + $0x28] sm:$0xff]  ;;  %v17_v4 = vld [vmem:[%s137_s1 + $0x10] sm:$0xff]  ;;  %v18_v5 = vld [vmem:[%s137_s1 + $0x18] sm:$0xff] }
   0x3   :  { %v15_v6 = vld [vmem:[%s137_s1] sm:$0xff]  ;;  %v16_v7 = vld [vmem:[%s137_s1 + $0x8] sm:$0xff] }
   0x4   :  { %46 = vmatpush.msra.mxu0 %v19_v2  ;;  %66 = vmatpush.msra.mxu1 %v20_v3  ;;  %v14_v8 = vld [vmem:[%s138_s0] sm:$0xff] }
   0x5   :  { %v23_v9 = vld [vmem:[%s139_s2] sm:$0x3] }
   0x6   :  { %47 = vmatpush.msra.mxu0 %v17_v4  ;;  %67 = vmatpush.msra.mxu1 %v18_v5  ;;  %v25_v10 = vperm.slane %v23_v9, 0  ;;  %v26_v11 = vperm.slane %v23_v9, 1 }
   0x8   :  { %48 = vmatpush.msra.mxu0 %v15_v6  ;;  %68 = vmatpush.msra.mxu1 %v16_v7 }
   0x9   :  { %79 = vmatmul.msk.f32.vlgmr.msra.gmra.mxu0 %vm29_vm0, %v14_v8  ;;  %80 = vmatmul.msk.f32.vlgmr.msra.gmra.mxu1 %vm29_vm0, %v14_v8 }
  0x86   :  { %v50_v12 = vpop.f32.mrf.mxu0  ;;  %v70_v13 = vpop.f32.mrf.mxu1 }
  0x87   :  { %v51_v14 = vadd.f32 %v50_v12, %v25_v10  ;;  %v71_v15 = vadd.f32 %v70_v13, %v26_v11 }
  0x89   :  { %73 = vst [vmem:[%s140_s3] sm:$0xff] %v51_v14 }
  0x8a   :  { %74 = vst [vmem:[%s140_s3 + $0x8] sm:$0xff] %v71_v15 }

</bundles_post_ra>
